<compile_context>
chip_gen: v7x
topology: tpu7x:2x2x1
jax: 0.10.0
libtpu: 0.0.40
codegen_flags: <defaults>
</compile_context>

<pallas_src>
import functools

import jax
import jax.numpy as jnp
import numpy as np
from jax.experimental import pallas as pl
from jax.experimental.pallas import tpu as pltpu


def _round_up(x, m):
    return (x + m - 1) // m * m


def _convblock_kernel(x_ref, w_ref, b_ref, mask_ref, sel_ref, o_ref,
                      xe_ref, col_ref, acc_ref, *,
                      W, KH, KW, pad, Cin, pool, HW, lead, A, Lm,
                      Hpool, Wpool, sel_w, out_valid):
    # x_ref:    (1, Cin, H*W)        one image; channels on sublanes, pixels on lanes
    # w_ref:    (Cout, Cin*KH*KW)    im2col weight matrix (compute dtype)
    # b_ref:    (Cout, 1)            bias, float32
    # mask_ref: (KW, 1, A)           0/1 masks killing row-wrap border columns
    # sel_ref:  (sel_w, 128*)        shared one-hot column-decimation selector, f32
    # o_ref:    (1, Cout, OUT_LANES) lane-dense pooled output slab
    # xe_ref:   (Cin, XE)            scratch: zero halo + flattened image (compute dtype)
    # col_ref:  (Cin*KH*KW, A)       scratch: im2col stack (compute dtype)
    # acc_ref:  (Cout, A)            scratch: f32 conv accumulator
    dt = xe_ref.dtype
    XE = xe_ref.shape[1]
    Cout = o_ref.shape[1]

    # 1) Zero ONLY the halo slices, then one lane-aligned store of the image
    #    interior (lead is a multiple of 128).
    if lead > 0:
        xe_ref[:, :lead] = jnp.zeros((Cin, lead), dt)
    if XE - lead - HW > 0:
        xe_ref[:, lead + HW:] = jnp.zeros((Cin, XE - lead - HW), dt)
    xe_ref[:, lead:lead + HW] = x_ref[0].astype(dt)

    # 2) im2col build: KH*KW lane-shifted Ref slices of xe, border columns
    #    killed by the per-kw masks (fused into the store), written once into
    #    the (Cin*KH*KW, A) stack.  No whole-buffer value materialization.
    for kh in range(KH):
        for kw in range(KW):
            t = kh * KW + kw
            start = lead + (kh - pad) * W + (kw - pad)   # static lane shift
            patch = xe_ref[:, start:start + A]           # (Cin, A)
            if kw != pad:                                # interior tap needs no mask
                patch = patch * mask_ref[kw]
            col_ref[t * Cin:(t + 1) * Cin, :] = patch

    # 3) ONE MXU matmul (contraction dim = Cin*KH*KW) + bias + ReLU, f32 acc in VMEM.
    acc_ref[...] = jnp.maximum(
        jnp.dot(w_ref[...], col_ref[...], preferred_element_type=jnp.float32)
        + b_ref[...], 0.0)

    # 4) MaxPool window maxima: pool*pool - 1 shifted lane maxima (VPU), exact f32.
    m = acc_ref[:, :Lm]
    for di in range(pool):
        for dj in range(pool):
            if di == 0 and dj == 0:
                continue
            off = di * W + dj
            m = jnp.maximum(m, acc_ref[:, off:off + Lm])

    # 5) Stride-`pool` decimation per pooled output row with a tiny SHARED
    #    one-hot selector (linear-size, replaces the old quadratic selector).
    for ii in range(Hpool):
        base = pool * ii * W
        row = jnp.dot(m[:, base:base + sel_w], sel_ref[...],
                      preferred_element_type=jnp.float32)   # (Cout, 128*)
        o_ref[0, :, ii * Wpool:(ii + 1) * Wpool] = row[:, :Wpool].astype(o_ref.dtype)

    out_lanes = o_ref.shape[-1]
    if out_valid < out_lanes:                                # keep padding lanes deterministic
        o_ref[0, :, out_valid:] = jnp.zeros((Cout, out_lanes - out_valid), o_ref.dtype)


def conv_block(x_nchw, weight, bias, *, pool_size=2, padding=None,
               compute_dtype=jnp.bfloat16):
    """ConvBlock forward.  x_nchw: (N, Cin, H, W); weight: (Cout, Cin, KH, KW).

    Returns NCHW (N, Cout, Ho//pool, Wo//pool), matching the PyTorch module.
    compute_dtype: dtype of the conv matmul operands (default bfloat16 for
    v6e/v7x MXU peak); accumulation and the pooling path stay float32/exact.
    Pass jnp.float32 for bit-accurate-ish results (or on v5e).
    """
    N, Cin, H, W = x_nchw.shape
    Cout, Cin_w, KH, KW = weight.shape
    assert Cin_w == Cin
    if padding is None:
        padding = (KH - 1) // 2
    p = int(padding)
    pool = int(pool_size)
    if compute_dtype is None:
        compute_dtype = x_nchw.dtype

    Ho = H + 2 * p - KH + 1
    Wo = W + 2 * p - KW + 1
    Hpool, Wpool = Ho // pool, Wo // pool
    if Ho < 1 or Wo < 1 or Hpool < 1 or Wpool < 1:
        raise ValueError("empty output for the given shapes")
    if 2 * p > KW - 1 or 2 * p > KH - 1:
        # TODO(synk): padding > (kernel_size-1)//2 needs a padded row stride.
        raise NotImplementedError("padding > (kernel_size - 1) // 2 not supported")

    HW = H * W
    lead = _round_up(p * W + p, 128)                 # aligned interior store
    sel_w = (Wpool - 1) * pool + 1
    Lm = (Hpool - 1) * pool * W + sel_w              # window-maxima width needed
    A = _round_up(Lm + (pool - 1) * (W + 1), 128)    # lane-dense accumulator width
    XE = _round_up(max(lead + (KH - 1 - p) * W + (KW - 1 - p) + A, lead + HW), 128)
    out_valid = Hpool * Wpool
    out_lanes = _round_up(out_valid, 128)
    sel_cols = _round_up(Wpool, 128)
    CKK = Cin * KH * KW

    # x stays NCHW: collapsing (H, W) is a free reshape -- no transpose, no pad.
    x_flat = x_nchw.reshape(N, Cin, HW)
    # (Cout, KH, KW, Cin) -> (Cout, Cin*KH*KW), row order matches the im2col stack.
    w_mat = jnp.transpose(weight, (0, 2, 3, 1)).reshape(Cout, CKK).astype(compute_dtype)
    b2 = bias.reshape(Cout, 1).astype(jnp.float32)

    # Per-kw 0/1 masks killing row-wrap contributions at the W borders
    # (exact in bf16, applied to (Cin, A) im2col tiles).
    cols = np.arange(A) % W
    masks = np.stack(
        [((cols + (kw - p) >= 0) & (cols + (kw - p) < W)).astype(np.float32)
         for kw in range(KW)], axis=0)[:, None, :]
    masks = jnp.asarray(masks, dtype=compute_dtype)

    # Shared one-hot column-decimation selector (linear size; stays float32).
    sel = np.zeros((sel_w, sel_cols), dtype=np.float32)
    for jj in range(Wpool):
        sel[pool * jj, jj] = 1.0
    sel = jnp.asarray(sel)

    kernel = functools.partial(
        _convblock_kernel, W=W, KH=KH, KW=KW, pad=p, Cin=Cin, pool=pool,
        HW=HW, lead=lead, A=A, Lm=Lm, Hpool=Hpool, Wpool=Wpool,
        sel_w=sel_w, out_valid=out_valid)

    # TODO(synk): for production H/W add a second ("parallel") grid axis over
    # output-row strips with a KH-1 halo (and a per-strip decimation) so blocks
    # stay a few MiB on v7x's 64 MiB VMEM; also consider packing 2 images per
    # grid step when N is large (at N=2 it would defeat megacore sharding).
    out = pl.pallas_call(
        kernel,
        out_shape=jax.ShapeDtypeStruct((N, Cout, out_lanes), x_nchw.dtype),
        grid_spec=pltpu.PrefetchScalarGridSpec(
            num_scalar_prefetch=0,
            grid=(N,),                               # batch shards across v7x's 2 TCs
            in_specs=[
                pl.BlockSpec((1, Cin, HW), lambda n: (n, 0, 0)),
                pl.BlockSpec((Cout, CKK), lambda n: (0, 0)),
                pl.BlockSpec((Cout, 1), lambda n: (0, 0)),
                pl.BlockSpec((KW, 1, A), lambda n: (0, 0, 0)),
                pl.BlockSpec((sel_w, sel_cols), lambda n: (0, 0)),
            ],
            out_specs=pl.BlockSpec((1, Cout, out_lanes), lambda n: (n, 0, 0)),
            scratch_shapes=[
                pltpu.VMEM((Cin, XE), compute_dtype),        # zero-halo image
                pltpu.VMEM((CKK, A), compute_dtype),         # im2col stack
                pltpu.VMEM((Cout, A), jnp.float32),          # f32 conv accumulator
            ],
        ),
        compiler_params=pltpu.CompilerParams(
            dimension_semantics=("parallel",),
            vmem_limit_bytes=32 * 1024 * 1024),
    )(x_flat, w_mat, b2, masks, sel)

    # Lane-dense slab -> NCHW: a slice + free reshape in the wrapper.
    return out[:, :, :out_valid].reshape(N, Cout, Hpool, Wpool)


def _reference(x_nchw, weight, bias, *, pool_size=2, padding=None):
    """Pure-JAX reference (lax.conv) for correctness checking."""
    Cout, Cin, KH, KW = weight.shape
    if padding is None:
        padding = (KH - 1) // 2
    y = jax.lax.conv_general_dilated(
        x_nchw, weight,
        window_strides=(1, 1),
        padding=((padding, padding), (padding, padding)),
        dimension_numbers=("NCHW", "OIHW", "NCHW"),
    )
    y = y + bias.reshape(1, Cout, 1, 1)
    y = jnp.maximum(y, 0.0)
    y = jax.lax.reduce_window(
        y, -jnp.inf, jax.lax.max,
        window_dimensions=(1, 1, pool_size, pool_size),
        window_strides=(1, 1, pool_size, pool_size),
        padding="VALID",
    )
    return y


if __name__ == "__main__":
    # Small shapes consistent with the module: batch=2, Cin=4, Cout=8, 16x16, k=3.
    N, Cin, Cout, H, W, K, POOL = 2, 4, 8, 16, 16, 3, 2

    key = jax.random.PRNGKey(0)
    kx, kwt, kb = jax.random.split(key, 3)
    x = jax.random.normal(kx, (N, Cin, H, W), dtype=jnp.float32)
    fan_in = Cin * K * K
    bound = 1.0 / np.sqrt(fan_in)
    weight = jax.random.uniform(kwt, (Cout, Cin, K, K), jnp.float32, -bound, bound)
    bias = jax.random.uniform(kb, (Cout,), jnp.float32, -bound, bound)

    ref = jax.block_until_ready(_reference(x, weight, bias, pool_size=POOL))

    # Exact-operand path (float32 conv operands) -- tight tolerance.
    out_f32 = jax.block_until_ready(
        conv_block(x, weight, bias, pool_size=POOL, compute_dtype=jnp.float32))
    assert out_f32.shape == (N, Cout, H // POOL, W // POOL), out_f32.shape
    if not np.allclose(np.asarray(out_f32), np.asarray(ref), atol=1e-4, rtol=1e-4):
        raise AssertionError("Pallas ConvBlock (f32 operands) mismatch vs reference")

    # Default bf16 conv-operand path (f32 accumulation) -- bf16-level tolerance.
    out_bf16 = jax.block_until_ready(conv_block(x, weight, bias, pool_size=POOL))
    assert out_bf16.shape == (N, Cout, H // POOL, W // POOL), out_bf16.shape
    if not np.allclose(np.asarray(out_bf16), np.asarray(ref), atol=5e-2, rtol=5e-2):
        raise AssertionError("Pallas ConvBlock (bf16 operands) mismatch vs reference")

    print("KERNEL_OK")
</pallas_src>

<mosaic_0001>
module attributes {stable_mosaic.version = 11 : i64} {
  func.func @_convblock_kernel(%arg0: i32, %arg1: memref<1x4x256xf32, #tpu.memory_space<vmem>>, %arg2: memref<8x36xf32, #tpu.memory_space<vmem>>, %arg3: memref<8x1xf32, #tpu.memory_space<vmem>>, %arg4: memref<3x1x256xf32, #tpu.memory_space<vmem>>, %arg5: memref<15x128xf32, #tpu.memory_space<vmem>>, %arg6: memref<1x8x128xf32, #tpu.memory_space<vmem>>, %arg7: memref<4x512xf32, #tpu.memory_space<vmem>>, %arg8: memref<36x256xf32, #tpu.memory_space<vmem>>, %arg9: memref<8x256xf32, #tpu.memory_space<vmem>>) attributes {dimension_semantics = [#tpu.dimension_semantics<parallel>], iteration_bounds = array<i64: 2>, scalar_prefetch = 0 : i64, scratch_operands = 3 : i64, tpu.core_type = #tpu.core_type<tc>, window_params = [{transform_indices = @transform_0, window_bounds = array<i64: 1, 4, 256>}, {pipeline_mode = #tpu.pipeline_mode<synchronous>, transform_indices = @transform_1, window_bounds = array<i64: 8, 36>}, {pipeline_mode = #tpu.pipeline_mode<synchronous>, transform_indices = @transform_2, window_bounds = array<i64: 8, 1>}, {pipeline_mode = #tpu.pipeline_mode<synchronous>, transform_indices = @transform_3, window_bounds = array<i64: 3, 1, 256>}, {pipeline_mode = #tpu.pipeline_mode<synchronous>, transform_indices = @transform_4, window_bounds = array<i64: 15, 128>}, {transform_indices = @transform_5, window_bounds = array<i64: 1, 8, 128>}]} {
    %cst = arith.constant 0.000000e+00 : f32
    %0 = vector.broadcast %cst : f32 to vector<4x128xf32>
    %c0 = arith.constant 0 : index
    %c0_0 = arith.constant 0 : index
    %1 = vector.load %arg7[%c0, %c0_0] : memref<4x512xf32, #tpu.memory_space<vmem>>, vector<4x128xf32>
    tpu.vector_store %arg7[%c0, %c0_0], %0 {strides = array<i32>} : memref<4x512xf32, #tpu.memory_space<vmem>>, vector<4x128xf32>,
    %cst_1 = arith.constant 0.000000e+00 : f32
    %2 = vector.broadcast %cst_1 : f32 to vector<4x128xf32>
    %c0_2 = arith.constant 0 : index
    %c384 = arith.constant 384 : index
    %3 = vector.load %arg7[%c0_2, %c384] : memref<4x512xf32, #tpu.memory_space<vmem>>, vector<4x128xf32>
    tpu.vector_store %arg7[%c0_2, %c384], %2 {strides = array<i32>} : memref<4x512xf32, #tpu.memory_space<vmem>>, vector<4x128xf32>,
    %c0_3 = arith.constant 0 : index
    %c0_4 = arith.constant 0 : index
    %c0_5 = arith.constant 0 : index
    %4 = vector.load %arg1[%c0_3, %c0_4, %c0_5] : memref<1x4x256xf32, #tpu.memory_space<vmem>>, vector<1x4x256xf32>
    %5 = vector.shape_cast %4 : vector<1x4x256xf32> to vector<4x256xf32>
    %c0_6 = arith.constant 0 : index
    %c128 = arith.constant 128 : index
    %6 = vector.load %arg7[%c0_6, %c128] : memref<4x512xf32, #tpu.memory_space<vmem>>, vector<4x256xf32>
    tpu.vector_store %arg7[%c0_6, %c128], %5 {strides = array<i32>} : memref<4x512xf32, #tpu.memory_space<vmem>>, vector<4x256xf32>,
    %c0_7 = arith.constant 0 : index
    %c111 = arith.constant 111 : index
    %7 = vector.load %arg7[%c0_7, %c111] : memref<4x512xf32, #tpu.memory_space<vmem>>, vector<4x256xf32>
    %c0_8 = arith.constant 0 : index
    %c0_9 = arith.constant 0 : index
    %c0_10 = arith.constant 0 : index
    %8 = vector.load %arg4[%c0_8, %c0_9, %c0_10] : memref<3x1x256xf32, #tpu.memory_space<vmem>>, vector<1x1x256xf32>
    %9 = vector.shape_cast %8 : vector<1x1x256xf32> to vector<1x256xf32>
    %10 = vector.broadcast %9 : vector<1x256xf32> to vector<4x256xf32>
    %11 = arith.mulf %7, %10 : vector<4x256xf32>
    %c0_11 = arith.constant 0 : index
    %c0_12 = arith.constant 0 : index
    %12 = vector.load %arg8[%c0_11, %c0_12] : memref<36x256xf32, #tpu.memory_space<vmem>>, vector<4x256xf32>
    tpu.vector_store %arg8[%c0_11, %c0_12], %11 {strides = array<i32>} : memref<36x256xf32, #tpu.memory_space<vmem>>, vector<4x256xf32>,
    %c0_13 = arith.constant 0 : index
    %c112 = arith.constant 112 : index
    %13 = vector.load %arg7[%c0_13, %c112] : memref<4x512xf32, #tpu.memory_space<vmem>>, vector<4x256xf32>
    %c4 = arith.constant 4 : index
    %c0_14 = arith.constant 0 : index
    %14 = vector.load %arg8[%c4, %c0_14] : memref<36x256xf32, #tpu.memory_space<vmem>>, vector<4x256xf32>
    tpu.vector_store %arg8[%c4, %c0_14], %13 {strides = array<i32>} : memref<36x256xf32, #tpu.memory_space<vmem>>, vector<4x256xf32>,
    %c0_15 = arith.constant 0 : index
    %c113 = arith.constant 113 : index
    %15 = vector.load %arg7[%c0_15, %c113] : memref<4x512xf32, #tpu.memory_space<vmem>>, vector<4x256xf32>
    %c2 = arith.constant 2 : index
    %c0_16 = arith.constant 0 : index
    %c0_17 = arith.constant 0 : index
    %16 = vector.load %arg4[%c2, %c0_16, %c0_17] : memref<3x1x256xf32, #tpu.memory_space<vmem>>, vector<1x1x256xf32>
    %17 = vector.shape_cast %16 : vector<1x1x256xf32> to vector<1x256xf32>
    %18 = vector.broadcast %17 : vector<1x256xf32> to vector<4x256xf32>
    %19 = arith.mulf %15, %18 : vector<4x256xf32>
    %c8 = arith.constant 8 : index
    %c0_18 = arith.constant 0 : index
    %20 = vector.load %arg8[%c8, %c0_18] : memref<36x256xf32, #tpu.memory_space<vmem>>, vector<4x256xf32>
    tpu.vector_store %arg8[%c8, %c0_18], %19 {strides = array<i32>} : memref<36x256xf32, #tpu.memory_space<vmem>>, vector<4x256xf32>,
    %c0_19 = arith.constant 0 : index
    %c127 = arith.constant 127 : index
    %21 = vector.load %arg7[%c0_19, %c127] : memref<4x512xf32, #tpu.memory_space<vmem>>, vector<4x256xf32>
    %c0_20 = arith.constant 0 : index
    %c0_21 = arith.constant 0 : index
    %c0_22 = arith.constant 0 : index
    %22 = vector.load %arg4[%c0_20, %c0_21, %c0_22] : memref<3x1x256xf32, #tpu.memory_space<vmem>>, vector<1x1x256xf32>
    %23 = vector.shape_cast %22 : vector<1x1x256xf32> to vector<1x256xf32>
    %24 = vector.broadcast %23 : vector<1x256xf32> to vector<4x256xf32>
    %25 = arith.mulf %21, %24 : vector<4x256xf32>
    %c12 = arith.constant 12 : index
    %c0_23 = arith.constant 0 : index
    %26 = vector.load %arg8[%c12, %c0_23] : memref<36x256xf32, #tpu.memory_space<vmem>>, vector<4x256xf32>
    tpu.vector_store %arg8[%c12, %c0_23], %25 {strides = array<i32>} : memref<36x256xf32, #tpu.memory_space<vmem>>, vector<4x256xf32>,
    %c0_24 = arith.constant 0 : index
    %c128_25 = arith.constant 128 : index
    %27 = vector.load %arg7[%c0_24, %c128_25] : memref<4x512xf32, #tpu.memory_space<vmem>>, vector<4x256xf32>
    %c16 = arith.constant 16 : index
    %c0_26 = arith.constant 0 : index
    %28 = vector.load %arg8[%c16, %c0_26] : memref<36x256xf32, #tpu.memory_space<vmem>>, vector<4x256xf32>
    tpu.vector_store %arg8[%c16, %c0_26], %27 {strides = array<i32>} : memref<36x256xf32, #tpu.memory_space<vmem>>, vector<4x256xf32>,
    %c0_27 = arith.constant 0 : index
    %c129 = arith.constant 129 : index
    %29 = vector.load %arg7[%c0_27, %c129] : memref<4x512xf32, #tpu.memory_space<vmem>>, vector<4x256xf32>
    %c2_28 = arith.constant 2 : index
    %c0_29 = arith.constant 0 : index
    %c0_30 = arith.constant 0 : index
    %30 = vector.load %arg4[%c2_28, %c0_29, %c0_30] : memref<3x1x256xf32, #tpu.memory_space<vmem>>, vector<1x1x256xf32>
    %31 = vector.shape_cast %30 : vector<1x1x256xf32> to vector<1x256xf32>
    %32 = vector.broadcast %31 : vector<1x256xf32> to vector<4x256xf32>
    %33 = arith.mulf %29, %32 : vector<4x256xf32>
    %c20 = arith.constant 20 : index
    %c0_31 = arith.constant 0 : index
    %34 = vector.load %arg8[%c20, %c0_31] : memref<36x256xf32, #tpu.memory_space<vmem>>, vector<4x256xf32>
    tpu.vector_store %arg8[%c20, %c0_31], %33 {strides = array<i32>} : memref<36x256xf32, #tpu.memory_space<vmem>>, vector<4x256xf32>,
    %c0_32 = arith.constant 0 : index
    %c143 = arith.constant 143 : index
    %35 = vector.load %arg7[%c0_32, %c143] : memref<4x512xf32, #tpu.memory_space<vmem>>, vector<4x256xf32>
    %c0_33 = arith.constant 0 : index
    %c0_34 = arith.constant 0 : index
    %c0_35 = arith.constant 0 : index
    %36 = vector.load %arg4[%c0_33, %c0_34, %c0_35] : memref<3x1x256xf32, #tpu.memory_space<vmem>>, vector<1x1x256xf32>
    %37 = vector.shape_cast %36 : vector<1x1x256xf32> to vector<1x256xf32>
    %38 = vector.broadcast %37 : vector<1x256xf32> to vector<4x256xf32>
    %39 = arith.mulf %35, %38 : vector<4x256xf32>
    %c24 = arith.constant 24 : index
    %c0_36 = arith.constant 0 : index
    %40 = vector.load %arg8[%c24, %c0_36] : memref<36x256xf32, #tpu.memory_space<vmem>>, vector<4x256xf32>
    tpu.vector_store %arg8[%c24, %c0_36], %39 {strides = array<i32>} : memref<36x256xf32, #tpu.memory_space<vmem>>, vector<4x256xf32>,
    %c0_37 = arith.constant 0 : index
    %c144 = arith.constant 144 : index
    %41 = vector.load %arg7[%c0_37, %c144] : memref<4x512xf32, #tpu.memory_space<vmem>>, vector<4x256xf32>
    %c28 = arith.constant 28 : index
    %c0_38 = arith.constant 0 : index
    %42 = vector.load %arg8[%c28, %c0_38] : memref<36x256xf32, #tpu.memory_space<vmem>>, vector<4x256xf32>
    tpu.vector_store %arg8[%c28, %c0_38], %41 {strides = array<i32>} : memref<36x256xf32, #tpu.memory_space<vmem>>, vector<4x256xf32>,
    %c0_39 = arith.constant 0 : index
    %c145 = arith.constant 145 : index
    %43 = vector.load %arg7[%c0_39, %c145] : memref<4x512xf32, #tpu.memory_space<vmem>>, vector<4x256xf32>
    %c2_40 = arith.constant 2 : index
    %c0_41 = arith.constant 0 : index
    %c0_42 = arith.constant 0 : index
    %44 = vector.load %arg4[%c2_40, %c0_41, %c0_42] : memref<3x1x256xf32, #tpu.memory_space<vmem>>, vector<1x1x256xf32>
    %45 = vector.shape_cast %44 : vector<1x1x256xf32> to vector<1x256xf32>
    %46 = vector.broadcast %45 : vector<1x256xf32> to vector<4x256xf32>
    %47 = arith.mulf %43, %46 : vector<4x256xf32>
    %c32 = arith.constant 32 : index
    %c0_43 = arith.constant 0 : index
    %48 = vector.load %arg8[%c32, %c0_43] : memref<36x256xf32, #tpu.memory_space<vmem>>, vector<4x256xf32>
    tpu.vector_store %arg8[%c32, %c0_43], %47 {strides = array<i32>} : memref<36x256xf32, #tpu.memory_space<vmem>>, vector<4x256xf32>,
    %c0_44 = arith.constant 0 : index
    %c0_45 = arith.constant 0 : index
    %49 = vector.load %arg2[%c0_44, %c0_45] : memref<8x36xf32, #tpu.memory_space<vmem>>, vector<8x36xf32>
    %c0_46 = arith.constant 0 : index
    %c0_47 = arith.constant 0 : index
    %50 = vector.load %arg8[%c0_46, %c0_47] : memref<36x256xf32, #tpu.memory_space<vmem>>, vector<36x256xf32>
    %cst_48 = arith.constant dense<0.000000e+00> : vector<8x256xf32>
    %51 = tpu.matmul %49, %50, %cst_48 {dimension_numbers = #tpu.dot_dimension_numbers<[1], [0], [0], [1], [0, 0, 1, 1], [], []>} : vector<8x36xf32>, vector<36x256xf32>, vector<8x256xf32> -> vector<8x256xf32>
    %c0_49 = arith.constant 0 : index
    %c0_50 = arith.constant 0 : index
    %52 = vector.load %arg3[%c0_49, %c0_50] : memref<8x1xf32, #tpu.memory_space<vmem>>, vector<8x1xf32>
    %53 = vector.broadcast %52 : vector<8x1xf32> to vector<8x256xf32>
    %54 = arith.addf %51, %53 : vector<8x256xf32>
    %cst_51 = arith.constant 0.000000e+00 : f32
    %55 = vector.broadcast %cst_51 : f32 to vector<8x256xf32>
    %56 = arith.maximumf %54, %55 : vector<8x256xf32>
    %c0_52 = arith.constant 0 : index
    %c0_53 = arith.constant 0 : index
    %57 = vector.load %arg9[%c0_52, %c0_53] : memref<8x256xf32, #tpu.memory_space<vmem>>, vector<8x256xf32>
    tpu.vector_store %arg9[%c0_52, %c0_53], %56 {strides = array<i32>} : memref<8x256xf32, #tpu.memory_space<vmem>>, vector<8x256xf32>,
    %c0_54 = arith.constant 0 : index
    %c0_55 = arith.constant 0 : index
    %58 = vector.load %arg9[%c0_54, %c0_55] : memref<8x256xf32, #tpu.memory_space<vmem>>, vector<8x239xf32>
    %c0_56 = arith.constant 0 : index
    %c1 = arith.constant 1 : index
    %59 = vector.load %arg9[%c0_56, %c1] : memref<8x256xf32, #tpu.memory_space<vmem>>, vector<8x239xf32>
    %60 = arith.maximumf %58, %59 : vector<8x239xf32>
    %c0_57 = arith.constant 0 : index
    %c16_58 = arith.constant 16 : index
    %61 = vector.load %arg9[%c0_57, %c16_58] : memref<8x256xf32, #tpu.memory_space<vmem>>, vector<8x239xf32>
    %62 = arith.maximumf %60, %61 : vector<8x239xf32>
    %c0_59 = arith.constant 0 : index
    %c17 = arith.constant 17 : index
    %63 = vector.load %arg9[%c0_59, %c17] : memref<8x256xf32, #tpu.memory_space<vmem>>, vector<8x239xf32>
    %64 = arith.maximumf %62, %63 : vector<8x239xf32>
    %65 = vector.extract_strided_slice %64 {offsets = [0, 0], sizes = [8, 15], strides = [1, 1]} : vector<8x239xf32> to vector<8x15xf32>
    %c0_60 = arith.constant 0 : index
    %c0_61 = arith.constant 0 : index
    %66 = vector.load %arg5[%c0_60, %c0_61] : memref<15x128xf32, #tpu.memory_space<vmem>>, vector<15x128xf32>
    %cst_62 = arith.constant dense<0.000000e+00> : vector<8x128xf32>
    %67 = tpu.matmul %65, %66, %cst_62 {dimension_numbers = #tpu.dot_dimension_numbers<[1], [0], [0], [1], [0, 0, 1, 1], [], []>} : vector<8x15xf32>, vector<15x128xf32>, vector<8x128xf32> -> vector<8x128xf32>
    %68 = vector.extract_strided_slice %67 {offsets = [0, 0], sizes = [8, 8], strides = [1, 1]} : vector<8x128xf32> to vector<8x8xf32>
    %c0_63 = arith.constant 0 : index
    %c0_64 = arith.constant 0 : index
    %c0_65 = arith.constant 0 : index
    %69 = vector.load %arg6[%c0_63, %c0_64, %c0_65] : memref<1x8x128xf32, #tpu.memory_space<vmem>>, vector<1x8x8xf32>
    %70 = vector.shape_cast %69 : vector<1x8x8xf32> to vector<8x8xf32>
    %71 = vector.shape_cast %68 : vector<8x8xf32> to vector<1x8x8xf32>
    tpu.vector_store %arg6[%c0_63, %c0_64, %c0_65], %71 {strides = array<i32>} : memref<1x8x128xf32, #tpu.memory_space<vmem>>, vector<1x8x8xf32>,
    %72 = vector.extract_strided_slice %64 {offsets = [0, 32], sizes = [8, 15], strides = [1, 1]} : vector<8x239xf32> to vector<8x15xf32>
    %c0_66 = arith.constant 0 : index
    %c0_67 = arith.constant 0 : index
    %73 = vector.load %arg5[%c0_66, %c0_67] : memref<15x128xf32, #tpu.memory_space<vmem>>, vector<15x128xf32>
    %cst_68 = arith.constant dense<0.000000e+00> : vector<8x128xf32>
    %74 = tpu.matmul %72, %73, %cst_68 {dimension_numbers = #tpu.dot_dimension_numbers<[1], [0], [0], [1], [0, 0, 1, 1], [], []>} : vector<8x15xf32>, vector<15x128xf32>, vector<8x128xf32> -> vector<8x128xf32>
    %75 = vector.extract_strided_slice %74 {offsets = [0, 0], sizes = [8, 8], strides = [1, 1]} : vector<8x128xf32> to vector<8x8xf32>
    %c0_69 = arith.constant 0 : index
    %c0_70 = arith.constant 0 : index
    %c8_71 = arith.constant 8 : index
    %76 = vector.load %arg6[%c0_69, %c0_70, %c8_71] : memref<1x8x128xf32, #tpu.memory_space<vmem>>, vector<1x8x8xf32>
    %77 = vector.shape_cast %76 : vector<1x8x8xf32> to vector<8x8xf32>
    %78 = vector.shape_cast %75 : vector<8x8xf32> to vector<1x8x8xf32>
    tpu.vector_store %arg6[%c0_69, %c0_70, %c8_71], %78 {strides = array<i32>} : memref<1x8x128xf32, #tpu.memory_space<vmem>>, vector<1x8x8xf32>,
    %79 = vector.extract_strided_slice %64 {offsets = [0, 64], sizes = [8, 15], strides = [1, 1]} : vector<8x239xf32> to vector<8x15xf32>
    %c0_72 = arith.constant 0 : index
    %c0_73 = arith.constant 0 : index
    %80 = vector.load %arg5[%c0_72, %c0_73] : memref<15x128xf32, #tpu.memory_space<vmem>>, vector<15x128xf32>
    %cst_74 = arith.constant dense<0.000000e+00> : vector<8x128xf32>
    %81 = tpu.matmul %79, %80, %cst_74 {dimension_numbers = #tpu.dot_dimension_numbers<[1], [0], [0], [1], [0, 0, 1, 1], [], []>} : vector<8x15xf32>, vector<15x128xf32>, vector<8x128xf32> -> vector<8x128xf32>
    %82 = vector.extract_strided_slice %81 {offsets = [0, 0], sizes = [8, 8], strides = [1, 1]} : vector<8x128xf32> to vector<8x8xf32>
    %c0_75 = arith.constant 0 : index
    %c0_76 = arith.constant 0 : index
    %c16_77 = arith.constant 16 : index
    %83 = vector.load %arg6[%c0_75, %c0_76, %c16_77] : memref<1x8x128xf32, #tpu.memory_space<vmem>>, vector<1x8x8xf32>
    %84 = vector.shape_cast %83 : vector<1x8x8xf32> to vector<8x8xf32>
    %85 = vector.shape_cast %82 : vector<8x8xf32> to vector<1x8x8xf32>
    tpu.vector_store %arg6[%c0_75, %c0_76, %c16_77], %85 {strides = array<i32>} : memref<1x8x128xf32, #tpu.memory_space<vmem>>, vector<1x8x8xf32>,
    %86 = vector.extract_strided_slice %64 {offsets = [0, 96], sizes = [8, 15], strides = [1, 1]} : vector<8x239xf32> to vector<8x15xf32>
    %c0_78 = arith.constant 0 : index
    %c0_79 = arith.constant 0 : index
    %87 = vector.load %arg5[%c0_78, %c0_79] : memref<15x128xf32, #tpu.memory_space<vmem>>, vector<15x128xf32>
    %cst_80 = arith.constant dense<0.000000e+00> : vector<8x128xf32>
    %88 = tpu.matmul %86, %87, %cst_80 {dimension_numbers = #tpu.dot_dimension_numbers<[1], [0], [0], [1], [0, 0, 1, 1], [], []>} : vector<8x15xf32>, vector<15x128xf32>, vector<8x128xf32> -> vector<8x128xf32>
    %89 = vector.extract_strided_slice %88 {offsets = [0, 0], sizes = [8, 8], strides = [1, 1]} : vector<8x128xf32> to vector<8x8xf32>
    %c0_81 = arith.constant 0 : index
    %c0_82 = arith.constant 0 : index
    %c24_83 = arith.constant 24 : index
    %90 = vector.load %arg6[%c0_81, %c0_82, %c24_83] : memref<1x8x128xf32, #tpu.memory_space<vmem>>, vector<1x8x8xf32>
    %91 = vector.shape_cast %90 : vector<1x8x8xf32> to vector<8x8xf32>
    %92 = vector.shape_cast %89 : vector<8x8xf32> to vector<1x8x8xf32>
    tpu.vector_store %arg6[%c0_81, %c0_82, %c24_83], %92 {strides = array<i32>} : memref<1x8x128xf32, #tpu.memory_space<vmem>>, vector<1x8x8xf32>,
    %93 = vector.extract_strided_slice %64 {offsets = [0, 128], sizes = [8, 15], strides = [1, 1]} : vector<8x239xf32> to vector<8x15xf32>
    %c0_84 = arith.constant 0 : index
    %c0_85 = arith.constant 0 : index
    %94 = vector.load %arg5[%c0_84, %c0_85] : memref<15x128xf32, #tpu.memory_space<vmem>>, vector<15x128xf32>
    %cst_86 = arith.constant dense<0.000000e+00> : vector<8x128xf32>
    %95 = tpu.matmul %93, %94, %cst_86 {dimension_numbers = #tpu.dot_dimension_numbers<[1], [0], [0], [1], [0, 0, 1, 1], [], []>} : vector<8x15xf32>, vector<15x128xf32>, vector<8x128xf32> -> vector<8x128xf32>
    %96 = vector.extract_strided_slice %95 {offsets = [0, 0], sizes = [8, 8], strides = [1, 1]} : vector<8x128xf32> to vector<8x8xf32>
    %c0_87 = arith.constant 0 : index
    %c0_88 = arith.constant 0 : index
    %c32_89 = arith.constant 32 : index
    %97 = vector.load %arg6[%c0_87, %c0_88, %c32_89] : memref<1x8x128xf32, #tpu.memory_space<vmem>>, vector<1x8x8xf32>
    %98 = vector.shape_cast %97 : vector<1x8x8xf32> to vector<8x8xf32>
    %99 = vector.shape_cast %96 : vector<8x8xf32> to vector<1x8x8xf32>
    tpu.vector_store %arg6[%c0_87, %c0_88, %c32_89], %99 {strides = array<i32>} : memref<1x8x128xf32, #tpu.memory_space<vmem>>, vector<1x8x8xf32>,
    %100 = vector.extract_strided_slice %64 {offsets = [0, 160], sizes = [8, 15], strides = [1, 1]} : vector<8x239xf32> to vector<8x15xf32>
    %c0_90 = arith.constant 0 : index
    %c0_91 = arith.constant 0 : index
    %101 = vector.load %arg5[%c0_90, %c0_91] : memref<15x128xf32, #tpu.memory_space<vmem>>, vector<15x128xf32>
    %cst_92 = arith.constant dense<0.000000e+00> : vector<8x128xf32>
    %102 = tpu.matmul %100, %101, %cst_92 {dimension_numbers = #tpu.dot_dimension_numbers<[1], [0], [0], [1], [0, 0, 1, 1], [], []>} : vector<8x15xf32>, vector<15x128xf32>, vector<8x128xf32> -> vector<8x128xf32>
    %103 = vector.extract_strided_slice %102 {offsets = [0, 0], sizes = [8, 8], strides = [1, 1]} : vector<8x128xf32> to vector<8x8xf32>
    %c0_93 = arith.constant 0 : index
    %c0_94 = arith.constant 0 : index
    %c40 = arith.constant 40 : index
    %104 = vector.load %arg6[%c0_93, %c0_94, %c40] : memref<1x8x128xf32, #tpu.memory_space<vmem>>, vector<1x8x8xf32>
    %105 = vector.shape_cast %104 : vector<1x8x8xf32> to vector<8x8xf32>
    %106 = vector.shape_cast %103 : vector<8x8xf32> to vector<1x8x8xf32>
    tpu.vector_store %arg6[%c0_93, %c0_94, %c40], %106 {strides = array<i32>} : memref<1x8x128xf32, #tpu.memory_space<vmem>>, vector<1x8x8xf32>,
    %107 = vector.extract_strided_slice %64 {offsets = [0, 192], sizes = [8, 15], strides = [1, 1]} : vector<8x239xf32> to vector<8x15xf32>
    %c0_95 = arith.constant 0 : index
    %c0_96 = arith.constant 0 : index
    %108 = vector.load %arg5[%c0_95, %c0_96] : memref<15x128xf32, #tpu.memory_space<vmem>>, vector<15x128xf32>
    %cst_97 = arith.constant dense<0.000000e+00> : vector<8x128xf32>
    %109 = tpu.matmul %107, %108, %cst_97 {dimension_numbers = #tpu.dot_dimension_numbers<[1], [0], [0], [1], [0, 0, 1, 1], [], []>} : vector<8x15xf32>, vector<15x128xf32>, vector<8x128xf32> -> vector<8x128xf32>
    %110 = vector.extract_strided_slice %109 {offsets = [0, 0], sizes = [8, 8], strides = [1, 1]} : vector<8x128xf32> to vector<8x8xf32>
    %c0_98 = arith.constant 0 : index
    %c0_99 = arith.constant 0 : index
    %c48 = arith.constant 48 : index
    %111 = vector.load %arg6[%c0_98, %c0_99, %c48] : memref<1x8x128xf32, #tpu.memory_space<vmem>>, vector<1x8x8xf32>
    %112 = vector.shape_cast %111 : vector<1x8x8xf32> to vector<8x8xf32>
    %113 = vector.shape_cast %110 : vector<8x8xf32> to vector<1x8x8xf32>
    tpu.vector_store %arg6[%c0_98, %c0_99, %c48], %113 {strides = array<i32>} : memref<1x8x128xf32, #tpu.memory_space<vmem>>, vector<1x8x8xf32>,
    %114 = vector.extract_strided_slice %64 {offsets = [0, 224], sizes = [8, 15], strides = [1, 1]} : vector<8x239xf32> to vector<8x15xf32>
    %c0_100 = arith.constant 0 : index
    %c0_101 = arith.constant 0 : index
    %115 = vector.load %arg5[%c0_100, %c0_101] : memref<15x128xf32, #tpu.memory_space<vmem>>, vector<15x128xf32>
    %cst_102 = arith.constant dense<0.000000e+00> : vector<8x128xf32>
    %116 = tpu.matmul %114, %115, %cst_102 {dimension_numbers = #tpu.dot_dimension_numbers<[1], [0], [0], [1], [0, 0, 1, 1], [], []>} : vector<8x15xf32>, vector<15x128xf32>, vector<8x128xf32> -> vector<8x128xf32>
    %117 = vector.extract_strided_slice %116 {offsets = [0, 0], sizes = [8, 8], strides = [1, 1]} : vector<8x128xf32> to vector<8x8xf32>
    %c0_103 = arith.constant 0 : index
    %c0_104 = arith.constant 0 : index
    %c56 = arith.constant 56 : index
    %118 = vector.load %arg6[%c0_103, %c0_104, %c56] : memref<1x8x128xf32, #tpu.memory_space<vmem>>, vector<1x8x8xf32>
    %119 = vector.shape_cast %118 : vector<1x8x8xf32> to vector<8x8xf32>
    %120 = vector.shape_cast %117 : vector<8x8xf32> to vector<1x8x8xf32>
    tpu.vector_store %arg6[%c0_103, %c0_104, %c56], %120 {strides = array<i32>} : memref<1x8x128xf32, #tpu.memory_space<vmem>>, vector<1x8x8xf32>,
    %cst_105 = arith.constant 0.000000e+00 : f32
    %121 = vector.broadcast %cst_105 : f32 to vector<8x64xf32>
    %c0_106 = arith.constant 0 : index
    %c0_107 = arith.constant 0 : index
    %c64 = arith.constant 64 : index
    %122 = vector.load %arg6[%c0_106, %c0_107, %c64] : memref<1x8x128xf32, #tpu.memory_space<vmem>>, vector<1x8x64xf32>
    %123 = vector.shape_cast %122 : vector<1x8x64xf32> to vector<8x64xf32>
    %124 = vector.shape_cast %121 : vector<8x64xf32> to vector<1x8x64xf32>
    tpu.vector_store %arg6[%c0_106, %c0_107, %c64], %124 {strides = array<i32>} : memref<1x8x128xf32, #tpu.memory_space<vmem>>, vector<1x8x64xf32>,
    return
  }
  func.func @transform_0(%arg0: i32) -> (i32, i32, i32) {
    %c0_i32 = arith.constant 0 : i32
    %c0_i32_0 = arith.constant 0 : i32
    %c0_i32_1 = arith.constant 0 : i32
    return %arg0, %c0_i32, %c0_i32_0 : i32, i32, i32
  }
  func.func @transform_1(%arg0: i32) -> (i32, i32) {
    %c0_i32 = arith.constant 0 : i32
    %c0_i32_0 = arith.constant 0 : i32
    %c0_i32_1 = arith.constant 0 : i32
    return %c0_i32, %c0_i32_0 : i32, i32
  }
  func.func @transform_2(%arg0: i32) -> (i32, i32) {
    %c0_i32 = arith.constant 0 : i32
    %c0_i32_0 = arith.constant 0 : i32
    %c0_i32_1 = arith.constant 0 : i32
    return %c0_i32, %c0_i32_0 : i32, i32
  }
  func.func @transform_3(%arg0: i32) -> (i32, i32, i32) {
    %c0_i32 = arith.constant 0 : i32
    %c0_i32_0 = arith.constant 0 : i32
    %c0_i32_1 = arith.constant 0 : i32
    %c0_i32_2 = arith.constant 0 : i32
    return %c0_i32, %c0_i32_0, %c0_i32_1 : i32, i32, i32
  }
  func.func @transform_4(%arg0: i32) -> (i32, i32) {
    %c0_i32 = arith.constant 0 : i32
    %c0_i32_0 = arith.constant 0 : i32
    %c0_i32_1 = arith.constant 0 : i32
    return %c0_i32, %c0_i32_0 : i32, i32
  }
  func.func @transform_5(%arg0: i32) -> (i32, i32, i32) {
    %c0_i32 = arith.constant 0 : i32
    %c0_i32_0 = arith.constant 0 : i32
    %c0_i32_1 = arith.constant 0 : i32
    return %arg0, %c0_i32, %c0_i32_0 : i32, i32, i32
  }
}

</mosaic_0001>

<bundles_post_ra>
// kernel: tpu_custom_call.1
= control target key start
LH: loop header
LB: loop body
LE: loop exit
PB: predicated region body
PF: predicated region fallthrough
CT: control target
= control target key end

     0   :  { %10 = vsyncpa [#allocation6], 0  ;;  %s2253_s0 = inlined_call_operand.hbm [shape: f32[2,4,256], index: 0, kind: input, shape index: {}]   ;;  %s2254_s1 = inlined_call_operand.vmem [shape: f32[8,36], index: 1, kind: input, shape index: {}]   ;;  %s2255_s2 = inlined_call_operand.vmem [shape: f32[8,1], index: 2, kind: input, shape index: {}]   ;;  %s2256_s3 = inlined_call_operand.hbm [shape: f32[3,1,256], index: 3, kind: input, shape index: {}]   ;;  %s2257_s4 = inlined_call_operand.vmem [shape: f32[15,128], index: 4, kind: input, shape index: {}]   ;;  %s2258_s5 = inlined_call_operand.hbm [shape: f32[2,8,128], index: 5, kind: output, shape index: {}]  }
   0x1   :  { %12 = vsyncpa [#allocation6 + $0x1], 0 }
   0x2   :  { %13 = vsyncpa [#allocation9], 0 }
   0x3   :  { %14 = vsyncpa [#allocation7], 0 }
   0x4   :  { %16 = vsyncpa [#allocation7 + $0x1], 0  ;;  %s1861_s18 = smov 0   ;;  %s1863_s19 = smov 0  }
   0x5   :  { %s1865_s20 = smov 0   ;;  %s1867_s21 = smov 0  }
   0x6 LB: > { %s1882_s22 = sadd.s32 4294967295, %s1803_s21   ;;  %s1434_s23 = sadd.s32 4294967294, %s1803_s21   ;;  %s1803_s21 = sphi %s1867_s21, %s2280_s21   ;;  %s1799_s20 = sphi %s1865_s20, %s2279_s20   ;;  %s1795_s19 = sphi %s1863_s19, %s2278_s19   ;;  %s1791_s18 = sphi %s1861_s18, %s2277_s18  }
   0x7   : > { %p42_p0 = scmp.ne.s32.totalorder %s1795_s19, %s1791_s18  ;;  %p2259_p1 = scmp.eq.s32.totalorder %s1882_s22, 0 }
   0x8   : > { %p156_p3 = scmp.eq.s32.totalorder %s1434_s23, 1  ;;  %p1435_p5 = scmp.ge.s32.totalorder %s1803_s21, 1 }
   0x9   : > { %p1891_p4 = por %p2259_p1, %p42_p0  ;;  %p163_p7 = scmp.lt.s32.totalorder %s1803_s21, 3 }
   0xa   : > { %p1896_p6 = por %p156_p3, %p42_p0  ;;  %s1805_s27 = smov [#allocation8]  }
   0xb   : > { %s2262_s24 = scalar_select %p1891_p4, 1, 0 }
   0xc   : > { %s2263_s25 = scalar_select %p1896_p6, 1, 0 }
   0xd   : > { %p1901_p8 = pnand %p1435_p5, %p163_p7  ;;  %s181_s28 = sshll.u32 %s1805_s27, 4  ;;  %s1905_s28 = int_to_ptr.vmem [resolvable:$true] %s181_s28 }
   0xe   : > { %s1917_s30 = sadd.s32 1, %s1803_s21   ;;  %s29_s6 = sadd.s32 1, %s1799_s20 }
   0xf   : > { %s2264_s26 = scalar_select %p1901_p8, 1, 0 }
  0x10   : > { %p1597_p9 = pneg %p1901_p8  ;;  %s26_s7 = ssub.s32 %s1803_s21, %s1917_s30 }
  0x11   : > { %s1675_s10 = scalar_lea.hbm %s2256_s3, 96 }
  0x12   : > { %p1912_p11 = pnand %p1597_p9, %p2259_p1  ;;  %p1676_p12 = scmp.ne.s32.totalorder %s2256_s3, %s1675_s10 }
  0x13   : > { %p1682_p5 = scmp.lt.u32.totalorder %s1675_s10, %s2256_s3 }
  0x14   : > { %p1677_p13 = pneg %p1912_p11 }
  0x16   : > { %p1678_p0 = pnand %p1677_p13, %p1676_p12 }
  0x18   : > { %p1679_p3 = pneg %p1678_p0 }
  0x1a   : > { %p1684_p7 = pnand %p1682_p5, %p1679_p3 }
  0x1c   : > { %1687 = shalt.err (!%p1684_p7)
}
  0x1d   : > { %s1688_s15 = scalar_lea.vmem %s1905_s28, 96  ;;  %p1696_p2 = scmp.lt.s32.totalorder %s1905_s28, %s1905_s28 }
  0x1e   : > { %p1689_p9 = scmp.ne.s32.totalorder %s1905_s28, %s1688_s15  ;;  %p1697_p6 = scmp.lt.s32.totalorder %s1688_s15, %s1688_s15 }
  0x20   : > { %p1691_p10 = pnand %p1689_p9, %p1677_p13  ;;  %p1698_p4 = por %p1697_p6, %p1696_p2 }
  0x22   : > { %p1692_p1 = pneg %p1691_p10 }
  0x24   : > { %p1699_p8 = pnand %p1698_p4, %p1692_p1 }
  0x26   : > { %1702 = shalt.err (!%p1699_p8)
}
  0x27   : > { %s1806_s16 = smov 32   ;;  %s1807_s17 = smov 2  }
  0x28   : > { %1600 = dma.hbm_to_vmem [thread:$0]  (!%p1912_p11), %s2256_s3, 96, %s1905_s28, [#allocation9], %s1806_s16, %s1806_s16, %s1807_s17  }
  0x29   : > { %p27_p2 = scmp.eq.s32.totalorder %s26_s7, 0  ;;  %p36_p1 = scmp.ne.s32.totalorder %s1799_s20, %s1795_s19 }
  0x2a   : > { %p37_p4 = scmp.eq.s32.totalorder %s1803_s21, 0  ;;  %p1610_p6 = scmp.lt.s32.totalorder %s1803_s21, 2 }
  0x2b   : > { %s1948_s8 = scalar_select %p27_p2, %s1799_s20, %s29_s6  }
  0x2c   : > { %p38_p8 = por %p37_p4, %p36_p1  ;;  %p2266_p10 = scmp.eq.s32.totalorder %s1882_s22, 1 }
  0x2d   : > { %s198_s10 = sand.u32 1, %s1799_s20   ;;  %s1468_s11 = sshll.u32 %s1803_s21, 7 }
  0x2e   : > { %p1952_p12 = por %p2266_p10, %p36_p1  ;;  %s1438_s12 = sshll.u32 %s198_s10, 3 }
  0x2f   : > { %s1961_s14 = scalar_lea.hbm %s2253_s0, %s1468_s11  ;;  %s202_s28 = scalar_lea.vmem [#allocation5], %s1438_s12 }
  0x30   : > { %s210_s6 = sshll.u32 %s202_s28, 4  ;;  %p1963_p11 = pnand %p1610_p6, %p38_p8  ;;  %s1967_s6 = int_to_ptr.vmem [resolvable:$true] %s210_s6 }
  0x31   : > { %s199_s15 = scalar_lea.sflag [#allocation6], %s198_s10  ;;  %s1703_s16 = scalar_lea.hbm %s1961_s14, 128 }
  0x32   : > { %p1704_p13 = scmp.ne.s32.totalorder %s1961_s14, %s1703_s16  ;;  %p1705_p0 = pneg %p1963_p11 }
  0x33   : > { %s1708_s27 = scalar_lea.hbm %s2253_s0, 256  ;;  %p1709_p7 = scmp.lt.u32.totalorder %s1961_s14, %s2253_s0 }
  0x34   : > { %p1706_p3 = pnand %p1705_p0, %p1704_p13  ;;  %p1710_p9 = scmp.lt.u32.totalorder %s1708_s27, %s1703_s16 }
  0x35   : > { %p1712_p1 = scmp.lt.u32.totalorder %s1703_s16, %s1961_s14 }
  0x36   : > { %p1707_p5 = pneg %p1706_p3  ;;  %p1711_p2 = por %p1710_p9, %p1709_p7 }
  0x38   : > { %p1713_p4 = por %p1712_p1, %p1711_p2 }
  0x3a   : > { %p1714_p6 = pnand %p1713_p4, %p1707_p5 }
  0x3c   : > { %1717 = shalt.err (!%p1714_p6)
}
  0x3d   : > { %s1718_s10 = scalar_lea.vmem %s1967_s6, 128  ;;  %s1808_s29 = smov [#allocation5]  }
  0x3e   : > { %p1719_p8 = scmp.ne.s32.totalorder %s1967_s6, %s1718_s10  ;;  %s1723_s13 = sshll.u32 %s1808_s29, 4  ;;  %s1724_s13 = int_to_ptr.vmem [resolvable:$false] %s1723_s13 }
  0x3f   : > { %s1725_s28 = scalar_lea.vmem %s1724_s13, 256  ;;  %p1726_p3 = scmp.lt.s32.totalorder %s1967_s6, %s1724_s13 }
  0x40   : > { %p1721_p10 = pnand %p1719_p8, %p1705_p0  ;;  %p1727_p7 = scmp.lt.s32.totalorder %s1725_s28, %s1718_s10 }
  0x42   : > { %p1722_p13 = pneg %p1721_p10  ;;  %p1728_p9 = por %p1727_p7, %p1726_p3 }
  0x44   : > { %p1729_p2 = pnand %p1728_p9, %p1722_p13 }
  0x46   : > { %1732 = shalt.err (!%p1729_p2)
}
  0x47   : > { %1604 = dma.hbm_to_vmem [thread:$0]  (!%p1963_p11), %s1961_s14, 128, %s1967_s6, %s199_s15  }
  0x48   : > { %p2269_p5 = scmp.ne.s32.totalorder %s2264_s26, 0 }
  0x49   : > { %s1997_s16 = sand.u32 (!%p2269_p5), 1, %s1795_s19   ;;  %p2270_p0 = scmp.ne.s32.totalorder (!%p2269_p5), %s2262_s24, 0 }
  0x4a   : > { %219 = sbr.rel (%p2269_p5) target bundleno = 1194 (0x4aa), region = 40  ;;  %s1442_s17 = sshll.u32 (!%p2269_p5), %s1997_s16, 3 }
  0x4b   : > { %s222_s23 = scalar_lea.sflag (!%p2269_p5), [#allocation6], %s1997_s16  ;;  %s225_s27 = scalar_lea.vmem (!%p2269_p5), [#allocation5], %s1442_s17 }
  0x51   : > { %1778 = dma.done.wait (%p2270_p0), %s222_s23, 128  }
  0x52   : > { %1780 = vsyncadd (%p2270_p0), %s222_s23, 4294967168  ;;  %p2271_p11 = scmp.eq.s32.totalorder %s1882_s22, 0 }
  0x54   : > { %1782 = dma.done.wait (%p2271_p11), [#allocation9], 96   ;;  %p2272_p1 = pmov %p2271_p11 }
  0x55   : > { %v264_v0 = vlaneseq  ;;  %v1809_v1 = vmov 0.0   ;;  %v358_v5 = vld [vmem:[#allocation8] sm:$0x3]  ;;  %v320_v7 = vld [vmem:[#allocation8 + $0x4] sm:$0x3]  ;;  %v2014_v19 = vld [vmem:[%s225_s27] sm:$0xff] }
  0x56   : > { %1784 = vsyncadd (%p2272_p1), [#allocation9], 4294967200  ;;  %256 = vst [vmem:[#allocation2] sm:$0xf] %v1809_v1  ;;  %621 = vmatprep.mubr.f32.mxu0 %v1809_v1  ;;  %v262_v6 = vld [vmem:[#allocation8] sm:$0x3]  ;;  %v397_v54 = vcombine.high %v2014_v19, %v2014_v19 }
  0x57   : > { %257 = vst [vmem:[#allocation2 + $0xc] sm:$0xf] %v1809_v1  ;;  %v265_v2 = vshrl.u32 %v264_v0, 7  ;;  %v440_v12 = vld [vmem:[#allocation8] sm:$0x3]  ;;  %259 = vst [vmem:[#allocation2 + $0x4] sm:$0xff] %v2014_v19 }
  0x58   : > { %v403_v13 = vld [vmem:[#allocation8 + $0x4] sm:$0x3]  ;;  %399 = vst [vmem:[#allocation3 + $0x20] sm:$0xf] %v2014_v19  ;;  %s1810_s24 = smov 127   ;;  %s1811_s26 = smov 111  }
  0x59   : > { %v266_v3 = vsub.s32 0, %v265_v2  ;;  %v270_v4 = vsub.s32 1, %v265_v2  ;;  %v495_v18 = vld [vmem:[#allocation8 + $0x4] sm:$0x3]  ;;  %s1812_s14 = smov 113   ;;  %s1813_s6 = smov 15  }
  0x5a   : > { %s1814_s7 = smov 1   ;;  %s1815_s15 = smov 17   ;;  %vm372_vm0 = vcmask 1039360   ;;  %vm276_vm1 = vcmask 908288   ;;  %vm334_vm2 = vcmask 924672   ;;  %vm388_vm3 = vcmask 7168  }
  0x5b   : > { %v363_v8 = vrot.slane %v358_v5, %v266_v3  ;;  %v367_v9 = vrot.slane %v358_v5, %v270_v4  ;;  %v267_v10 = vrot.slane %v262_v6, %v266_v3  ;;  %v271_v11 = vrot.slane %v262_v6, %v270_v4  ;;  %s1816_s11 = smov 16   ;;  %s1817_s12 = smov 112   ;;  %400 = vst [vmem:[#allocation3 + $0x28] sm:$0xf] %v397_v54 }
  0x5c   : > { %v325_v14 = vrot.slane %v320_v7, %v266_v3  ;;  %v329_v15 = vrot.slane %v320_v7, %v270_v4  ;;  %v445_v16 = vrot.slane %v440_v12, %v266_v3  ;;  %v449_v17 = vrot.slane %v440_v12, %v270_v4  ;;  %s1823_s10 = smov 96   ;;  %s1824_s29 = smov 32  }
  0x5d   : > { %v368_v20 = vcombine.low %v363_v8, %v367_v9  ;;  %v272_v21 = vcombine.low %v267_v10, %v271_v11  ;;  %v408_v23 = vrot.slane %v403_v13, %v266_v3  ;;  %v412_v24 = vrot.slane %v403_v13, %v270_v4  ;;  %s1826_s13 = smov 24   ;;  %s1828_s28 = smov 56  }
  0x5e   : > { %v330_v22 = vcombine.low %v325_v14, %v329_v15  ;;  %v450_v25 = vcombine.low %v445_v16, %v449_v17  ;;  %v500_v26 = vrot.slane %v495_v18, %v266_v3  ;;  %v504_v27 = vrot.slane %v495_v18, %v270_v4  ;;  %v1670_v30 = vld [vmem:[#allocation2 + $0x8] ss:$0 sps:$4 sm:$0xff]   ;;  %v298_v31 = vld [vmem:[#allocation2] sm:$0xff]  ;;  %v1672_v33 = vld [vmem:[#allocation2 + $0xc] ss:$0 sps:$4 sm:$0xff]   ;;  %s1829_s23 = smov 48  }
  0x5f   : > { %369 = vrot.lane.b32.xlu1 %v368_v20, %s1810_s24  ;;  %273 = vrot.lane.b32.xlu0 %v272_v21, %s1811_s26  ;;  %v413_v28 = vcombine.low %v408_v23, %v412_v24  ;;  %v302_v32 = vcombine.low %v298_v31, %v298_v31  ;;  %v261_v36 = vld [vmem:[#allocation2 + $0x8] sm:$0xf]  ;;  %v439_v48 = vld [vmem:[#allocation2 + $0xc] sm:$0xf]  ;;  %vm310_vm4 = vcmask 130048   ;;  %vm349_vm5 = vcmask 121856  }
  0x60   : > { %v505_v29 = vcombine.low %v500_v26, %v504_v27  ;;  %v318_v43 = vld [vmem:[#allocation2 + $0x8] sm:$0xf]  ;;  %v402_v60 = vld [vmem:[#allocation2 + $0xc] sm:$0xf]  ;;  %vm486_vm6 = vcmask 916480   ;;  %vm291_vm7 = vcmask 138240   ;;  %v478_v23 = vcombine.low %v2014_v19, %v2014_v19 }
  0x61   : > { %v357_v50 = vld [vmem:[#allocation2 + $0x8] sm:$0xf]  ;;  %v494_v24 = vld [vmem:[#allocation2 + $0xc] sm:$0xf]  ;;  %v1818_v26 = vmov 0   ;;  %v540_v27 = vld [vmem:[%s2255_s2] sm:$0xff] }
  0x62   : > { %1669 = vset.pattern.permute.xlu0 %v1818_v26  ;;  %vm550_vm8 = vcmask 1043456   ;;  %vm546_vm9 = vcmask 293888   ;;  %vm668_vm10 = vcmask 1046528   ;;  %vm1820_vm11 = vmmov 1  }
  0x63   : > { %331 = vrot.lane.b32.xlu0 %v330_v22, %s1812_s14  ;;  %451 = vrot.lane.b32.xlu1 %v450_v25, %s1813_s6  ;;  %vm2099_vm12 = vmpackc.low %vm668_vm10, %vm1820_vm11  ;;  %vm1821_vm13 = vmmov 0   ;;  %vm742_vm14 = vcmask 64512   ;;  %vm827_vm15 = vcmask 130112  }
  0x64   : > { %1497 = vmatprep.mubr.msk.f32.mxu1 %vm1821_vm13, %v1809_v1 }
  0x67   : > { %414 = vrot.lane.b32.xlu0 %v413_v28, %s1814_s7  ;;  %506 = vrot.lane.b32.xlu1 %v505_v29, %s1815_s15 }
  0x6b   : > { %308 = vrot.lane.b32.xlu1 %v1670_v30, %s1816_s11  ;;  %306 = vrot.lane.b32.xlu0 %v298_v31, %s1816_s11 }
  0x6f   : > { %304 = vrot.lane.b32.xlu1 %v302_v32, %s1816_s11  ;;  %482 = vrot.lane.b32.xlu0 %v2014_v19, %s1817_s12 }
  0x73   : > { %484 = vrot.lane.b32.xlu1 %v1672_v33, %s1817_s12 }
  0xd1   : > { %v370_v34 = vpop.permute.xlu1 %369  ;;  %v274_v35 = vpop.permute.xlu0 %273 }
  0xd2   : > { %v371_v37 = vrot.slane %v370_v34, 4  ;;  %v275_v38 = vrot.slane %v274_v35, 4 }
  0xd4   : > { %v373_v39 = vsel %vm372_vm0, %v371_v37, %v370_v34  ;;  %v281_v40 = vmul.f32 %v275_v38, %v261_v36  ;;  %v277_v45 = vsel %vm276_vm1, %v275_v38, %v274_v35  ;;  %v377_v58 = vmul.f32 %v371_v37, %v357_v50 }
  0xd5   : > { %v376_v41 = vmul.f32 %v373_v39, %v298_v31  ;;  %v332_v42 = vpop.permute.xlu0 %331  ;;  %v452_v44 = vpop.permute.xlu1 %451  ;;  %v280_v51 = vmul.f32 %v298_v31, %v277_v45 }
  0xd6   : > { %v333_v46 = vrot.slane %v332_v42, 4  ;;  %289 = vrot.lane.b32.xlu1 %v281_v40, %s1815_s15  ;;  %v453_v47 = vrot.slane %v452_v44, 4  ;;  %v381_v3 = vcombine.low %v377_v58, %v377_v58 }
  0xd7   : > { %384 = vrot.lane.b32.xlu0 %v376_v41, %s1814_s7  ;;  %v284_v10 = vcombine.high %v280_v51, %v280_v51  ;;  %v380_v15 = vcombine.low %v376_v41, %v376_v41 }
  0xd8   : > { %v339_v49 = vmul.f32 %v333_v46, %v318_v43  ;;  %v335_v55 = vsel %vm334_vm2, %v333_v46, %v332_v42  ;;  %v458_v56 = vmul.f32 %v453_v47, %v439_v48  ;;  %v454_v12 = vsel %vm349_vm5, %v453_v47, %v452_v44 }
  0xd9   : > { %v415_v52 = vpop.permute.xlu0 %414  ;;  %v507_v53 = vpop.permute.xlu1 %506  ;;  %v338_v59 = vmul.f32 %v335_v55, %v298_v31  ;;  %v457_v16 = vmul.f32 %v454_v12, %v2014_v19 }
  0xda   : > { %347 = vrot.lane.b32.xlu1 %v339_v49, %s1813_s6  ;;  %v416_v57 = vrot.slane %v415_v52, 4  ;;  %v508_v7 = vrot.slane %v507_v53, 4 }
  0xdb   : > { %285 = vrot.lane.b32.xlu0 %v280_v51, %s1815_s15  ;;  %v342_v17 = vcombine.high %v338_v59, %v338_v59  ;;  %v461_v20 = vcombine.high %v457_v16, %v457_v16 }
  0xdc   : > { %v417_v63 = vsel %vm388_vm3, %v416_v57, %v415_v52  ;;  %v421_v2 = vmul.f32 %v416_v57, %v402_v60  ;;  %v509_v14 = vsel %vm291_vm7, %v508_v7, %v507_v53  ;;  %v513_v25 = vmul.f32 %v508_v7, %v494_v24 }
  0xdd   : > { %v309_v61 = vpop.permute.xlu1 %308  ;;  %v307_v62 = vpop.permute.xlu0 %306  ;;  %v420_v4 = vmul.f32 %v417_v63, %v2014_v19  ;;  %v512_v18 = vmul.f32 %v509_v14, %v2014_v19 }
  0xde   : > { %466 = vrot.lane.b32.xlu1 %v458_v56, %s1812_s14  ;;  %v312_v0 = vsel %vm310_vm4, %v307_v62, %v309_v61  ;;  %v425_v9 = vcombine.low %v421_v2, %v421_v2 }
  0xdf   : > { %343 = vrot.lane.b32.xlu0 %v338_v59, %s1813_s6  ;;  %316 = vst [vmem:[#allocation3 + $0x8] sm:$0xf0] %v312_v0  ;;  %v516_v21 = vcombine.high %v512_v18, %v512_v18  ;;  %v424_v22 = vcombine.low %v420_v4, %v420_v4 }
  0xe1   : > { %v305_v5 = vpop.permute.xlu1 %304  ;;  %v2047_v8 = vpop.permute.xlu0 %482 }
  0xe2   : > { %386 = vrot.lane.b32.xlu1 %v381_v3, %s1814_s7  ;;  %v311_v6 = vsel %vm310_vm4, %v305_v5, %v307_v62  ;;  %vm1251_vm4 = vcmask 458112  }
  0xe3   : > { %428 = vrot.lane.b32.xlu0 %v420_v4, %s1810_s24  ;;  %315 = vst [vmem:[#allocation3] sm:$0xf0] %v311_v6 }
  0xe5   : > { %v485_v11 = vpop.permute.xlu1 %484 }
  0xe6   : > { %430 = vrot.lane.b32.xlu1 %v425_v9, %s1810_s24  ;;  %v488_v13 = vsel %vm486_vm6, %v2047_v8, %v485_v11 }
  0xe7   : > { %287 = vrot.lane.b32.xlu0 %v284_v10, %s1815_s15  ;;  %492 = vst [vmem:[#allocation3 + $0x38] sm:$0xf0] %v488_v13  ;;  %s1830_s15 = smov [#allocation10]  }
  0xea   : > { %382 = vrot.lane.b32.xlu1 %v380_v15, %s1814_s7  ;;  %v2091_v15 = vld [vmem:[%s2257_s4] sm:$0xff] }
  0xeb   : > { %345 = vrot.lane.b32.xlu0 %v342_v17, %s1813_s6  ;;  %v1819_v17 = vmov 0.0|0.0  }
  0xec   : > { %1557 = vmatprep.subr.bf16.mxu1 %v1819_v17 }
  0xee   : > { %462 = vrot.lane.b32.xlu1 %v457_v16, %s1812_s14  ;;  %v664_v16 = vld [vmem:[%s2257_s4 + $0x8] sm:$0x7f] }
  0xef   : > { %464 = vrot.lane.b32.xlu0 %v461_v20, %s1812_s14 }
  0xf2   : > { %519 = vrot.lane.b32.xlu1 %v516_v21, %s1811_s26 }
  0xf3   : > { %426 = vrot.lane.b32.xlu0 %v424_v22, %s1810_s24 }
  0xf6   : > { %517 = vrot.lane.b32.xlu1 %v512_v18, %s1811_s26  ;;  %v1558_v18 = vpack.c.bf16 %v664_v16, %v2091_v15 }
  0xf7   : > { %480 = vrot.lane.b32.xlu0 %v478_v23, %s1817_s12 }
  0xf8   : > { %1560 = vmatpush3.bf16.msk.msra.mxu1 %vm2099_vm12, %v1558_v18 }
  0xf9   : > { %1561 = vmatprep.subr.bf16.mxu1 %v1819_v17 }
  0xfb   : > { %521 = vrot.lane.b32.xlu0 %v513_v25, %s1811_s26  ;;  %v915_v25 = vld [vmem:[%s2257_s4 + $0x8] sm:$0x7f] }
  0xfc   : > { %v1570_v26 = vpack.c.bf16 %v915_v25, %v2091_v15 }
  0xff   : > { %543 = vperm.xlu0 %1669, %v540_v27  }
 0x148   : > { %v290_v28 = vpop.permute.xlu1 %289 }
 0x149   : > { %v385_v29 = vpop.permute.xlu0 %384 }
 0x14c   : > { %v348_v19 = vpop.permute.xlu1 %347 }
 0x14d   : > { %v286_v30 = vpop.permute.xlu0 %285 }
 0x150   : > { %v467_v31 = vpop.permute.xlu1 %466 }
 0x151   : > { %v344_v32 = vpop.permute.xlu0 %343 }
 0x154   : > { %v387_v33 = vpop.permute.xlu1 %386 }
 0x155   : > { %v390_v34 = vsel %vm388_vm3, %v385_v29, %v387_v33  ;;  %v429_v35 = vpop.permute.xlu0 %428 }
 0x156   : > { %394 = vst [vmem:[#allocation3 + $0x18] sm:$0xf0] %v390_v34 }
 0x158   : > { %v431_v36 = vpop.permute.xlu1 %430 }
 0x159   : > { %v433_v37 = vsel %vm372_vm0, %v429_v35, %v431_v36  ;;  %v288_v38 = vpop.permute.xlu0 %287 }
 0x15a   : > { %437 = vst [vmem:[#allocation3 + $0x28] sm:$0xf0] %v433_v37  ;;  %v292_v39 = vsel %vm291_vm7, %v286_v30, %v288_v38  ;;  %v293_v40 = vsel %vm291_vm7, %v288_v38, %v290_v28 }
 0x15b   : > { %296 = vst [vmem:[#allocation3] sm:$0xf] %v292_v39  ;;  %297 = vst [vmem:[#allocation3 + $0x8] sm:$0xf] %v293_v40 }
 0x15c   : > { %v383_v41 = vpop.permute.xlu1 %382 }
 0x15d   : > { %v389_v42 = vsel %vm388_vm3, %v383_v41, %v385_v29  ;;  %v346_v43 = vpop.permute.xlu0 %345  ;;  %vm1166_vm3 = vcmask 392512  }
 0x15e   : > { %393 = vst [vmem:[#allocation3 + $0x10] sm:$0xf0] %v389_v42  ;;  %v350_v44 = vsel %vm349_vm5, %v344_v32, %v346_v43  ;;  %v351_v45 = vsel %vm349_vm5, %v346_v43, %v348_v19  ;;  %v745_v32 = vld [vmem:[%s2257_s4 + $0x8] sm:$0x7f] }
 0x15f   : > { %354 = vst [vmem:[#allocation3 + $0x10] sm:$0xf] %v350_v44  ;;  %355 = vst [vmem:[#allocation3 + $0x18] sm:$0xf] %v351_v45  ;;  %v1562_v39 = vpack.c.bf16 %v745_v32, %v2091_v15  ;;  %v830_v42 = vld [vmem:[%s2257_s4 + $0x8] sm:$0x7f] }
 0x160   : > { %v463_v46 = vpop.permute.xlu1 %462  ;;  %v1566_v43 = vpack.c.bf16 %v830_v42, %v2091_v15  ;;  %v1000_v44 = vld [vmem:[%s2257_s4 + $0x8] sm:$0x7f] }
 0x161   : > { %v465_v47 = vpop.permute.xlu0 %464  ;;  %v535_v63 = vld [vmem:[#allocation3 + $0x28] sm:$0xff]  ;;  %v1084_v45 = vld [vmem:[%s2257_s4 + $0x8] sm:$0x7f] }
 0x162   : > { %v468_v48 = vsel %vm334_vm2, %v463_v46, %v465_v47  ;;  %v469_v49 = vsel %vm334_vm2, %v465_v47, %v467_v31  ;;  %v531_v52 = vld [vmem:[#allocation3 + $0x8] sm:$0xff]  ;;  %v530_v55 = vld [vmem:[#allocation3] sm:$0xff]  ;;  %vm1081_vm2 = vcmask 326912  }
 0x163   : > { %472 = vst [vmem:[#allocation3 + $0x30] sm:$0xf] %v468_v48  ;;  %473 = vst [vmem:[#allocation3 + $0x38] sm:$0xf] %v469_v49  ;;  %v1574_v48 = vpack.c.bf16 %v1000_v44, %v2091_v15  ;;  %v1578_v49 = vpack.c.bf16 %v1084_v45, %v2091_v15 }
 0x164   : > { %v520_v50 = vpop.permute.xlu1 %519 }
 0x165   : > { %v427_v51 = vpop.permute.xlu0 %426 }
 0x166   : > { %v432_v53 = vsel %vm372_vm0, %v427_v51, %v429_v35  ;;  %v533_v54 = vld [vmem:[#allocation3 + $0x18] sm:$0xff]  ;;  %v532_v56 = vld [vmem:[#allocation3 + $0x10] sm:$0xff] }
 0x167   : > { %436 = vst [vmem:[#allocation3 + $0x20] sm:$0xf0] %v432_v53  ;;  %v1549_v57 = vpack.c.bf16 %v533_v54, %v531_v52  ;;  %v1551_v58 = vpack.c.bf16 %v532_v56, %v530_v55  ;;  %v1254_v51 = vld [vmem:[%s2257_s4 + $0x8] sm:$0x7f] }
 0x168   : > { %v518_v59 = vpop.permute.xlu1 %517  ;;  %v1586_v55 = vpack.c.bf16 %v1254_v51, %v2091_v15 }
 0x169   : > { %v523_v60 = vsel %vm276_vm1, %v518_v59, %v520_v50  ;;  %1550 = vmatprep.subr.bf16.mxu0 %v1549_v57  ;;  %v481_v61 = vpop.permute.xlu0 %480 }
 0x16a   : > { %527 = vst [vmem:[#allocation3 + $0x40] sm:$0xf] %v523_v60  ;;  %v487_v62 = vsel %vm486_vm6, %v481_v61, %v2047_v8  ;;  %1552 = vmatpush1.bf16.msra.mxu0 %v1551_v58  ;;  %v537_v0 = vld [vmem:[#allocation3 + $0x38] sm:$0xff]  ;;  %v529_v8 = vld [vmem:[%s2254_s1] sm:$0xff] }
 0x16b   : > { %491 = vst [vmem:[#allocation3 + $0x30] sm:$0xf0] %v487_v62  ;;  %v1553_v2 = vpack.c.bf16 %v537_v0, %v535_v63 }
 0x16d   : > { %1554 = vmatprep.subr.bf16.mxu0 %v1553_v2  ;;  %v522_v3 = vpop.permute.xlu0 %521 }
 0x16e   : > { %v524_v4 = vsel %vm276_vm1, %v520_v50, %v522_v3  ;;  %v534_v5 = vld [vmem:[#allocation3 + $0x20] sm:$0xff]  ;;  %v1169_v50 = vld [vmem:[%s2257_s4 + $0x8] sm:$0x7f] }
 0x16f   : > { %528 = vst [vmem:[#allocation3 + $0x48] sm:$0xf] %v524_v4  ;;  %v1582_v54 = vpack.c.bf16 %v1169_v50, %v2091_v15 }
 0x171   : > { %v538_v10 = vld [vmem:[#allocation3 + $0x40] sm:$0xf] }
 0x172   : > { %v536_v6 = vld [vmem:[#allocation3 + $0x30] sm:$0xff] }
 0x173   : > { %v1555_v7 = vpack.c.bf16 %v536_v6, %v534_v5 }
 0x175   : > { %1556 = vmatpush1.bf16.msra.mxu0 %v1555_v7 }
 0x176   : > { %v539_v9 = vld [vmem:[#allocation3 + $0x48] sm:$0xf] }
 0x177   : > { %1445 = vmatprep.subr.msk.mxu0 %vm550_vm8, %v539_v9 }
 0x179   : > { %1446 = vmatpush1.msk.msra.mxu0 %vm550_vm8, %v538_v10 }
 0x17a   : > { %1447 = vmatmul.mubr.msk.f32.vlgmr.msra.gmra.mrb[0].mxu0 %vm546_vm9, %v529_v8  ;;  %1569 = vmatprep.subr.bf16.mxu0 %v1819_v17 }
 0x17b   : > { %1518 = vmatprep.mubr.msk.f32.mxu0 %vm1821_vm13, %v1809_v1  ;;  %1572 = vmatpush3.bf16.msk.msra.mxu0 %vm2099_vm12, %v1570_v26 }
 0x17c   : > { %1577 = vmatprep.subr.bf16.mxu0 %v1819_v17 }
 0x17e   : > { %v544_v11 = vpop.permute.xlu0 %543 }
 0x24d   : > { %v623_v12 = vpop.f32.mrb[0].mxu0 }
 0x24e   : > { %v624_v13 = vadd.f32 %v623_v12, %v544_v11  ;;  %v625_v14 = vpop.f32.mrb[1].mxu0 }
 0x24f   : > { %v626_v21 = vadd.f32 %v625_v14, %v544_v11 }
 0x250   : > { %v628_v20 = vmax.f32 %v624_v13, 0.0 }
 0x251   : > { %v629_v23 = vmax.f32 %v626_v21, 0.0 }
 0x252   : > { %645 = vrot.lane.b32.xlu0 %v628_v20, %s1817_s12  ;;  %636 = vrot.lane.b32.xlu1 %v628_v20, %s1810_s24 }
 0x256   : > { %654 = vrot.lane.b32.xlu0 %v628_v20, %s1811_s26  ;;  %638 = vrot.lane.b32.xlu1 %v629_v23, %s1810_s24  ;;  %s1737_s24 = sshll.u32 %s1830_s15, 4  ;;  %s1738_s24 = int_to_ptr.vmem [resolvable:$false] %s1737_s24 }
 0x25a   : > { %647 = vrot.lane.b32.xlu1 %v629_v23, %s1817_s12  ;;  %s1822_s12 = smov 64  }
 0x25e   : > { %656 = vrot.lane.b32.xlu1 %v629_v23, %s1811_s26  ;;  %s1739_s26 = scalar_lea.vmem %s1738_s24, 256 }
 0x2c4   : > { %v637_v24 = vpop.permute.xlu1 %636  ;;  %v646_v28 = vpop.permute.xlu0 %645 }
 0x2c8   : > { %v639_v27 = vpop.permute.xlu1 %638  ;;  %v655_v33 = vpop.permute.xlu0 %654 }
 0x2c9   : > { %v640_v29 = vsel %vm372_vm0, %v637_v24, %v639_v27  ;;  %v644_v37 = vmax.f32 %v629_v23, %v639_v27  ;;  %vm912_vm0 = vcmask 195712  }
 0x2ca   : > { %v643_v31 = vmax.f32 %v628_v20, %v640_v29 }
 0x2cc   : > { %v648_v19 = vpop.permute.xlu1 %647 }
 0x2cd   : > { %v649_v30 = vsel %vm486_vm6, %v646_v28, %v648_v19  ;;  %v653_v40 = vmax.f32 %v644_v37, %v648_v19  ;;  %vm1338_vm6 = vcmask 1048064  }
 0x2ce   : > { %v652_v34 = vmax.f32 %v643_v31, %v649_v30 }
 0x2d0   : > { %v657_v35 = vpop.permute.xlu1 %656 }
 0x2d1   : > { %v658_v36 = vsel %vm276_vm1, %v655_v33, %v657_v35  ;;  %v662_v41 = vmax.f32 %v653_v40, %v657_v35  ;;  %vm997_vm1 = vcmask 261312  }
 0x2d2   : > { %v661_v38 = vmax.f32 %v652_v34, %v658_v36 }
 0x2d4   : > { %831 = vrot.lane.b32.xlu1 %v661_v38, %s1822_s12  ;;  %746 = vrot.lane.b32.xlu0 %v661_v38, %s1823_s10 }
 0x2d5   : > { %1498 = vmatmul.mubr.msk.f32.vlgmr.msra.gmra.mrb[0].mxu1 %vm349_vm5, %v661_v38 }
 0x2d6   : > { %1564 = vmatpush3.bf16.msk.msra.mxu1 %vm2099_vm12, %v1562_v39  ;;  %1504 = vmatprep.mubr.msk.f32.mxu1 %vm1821_vm13, %v1809_v1 }
 0x2d7   : > { %1565 = vmatprep.subr.bf16.mxu1 %v1819_v17 }
 0x2d8   : > { %1085 = vrot.lane.b32.xlu1 %v662_v41, %s1823_s10  ;;  %916 = vrot.lane.b32.xlu0 %v661_v38, %s1824_s29  ;;  %s1825_s10 = smov 8  }
 0x2dc   : > { %1255 = vrot.lane.b32.xlu1 %v662_v41, %s1824_s29  ;;  %1170 = vrot.lane.b32.xlu0 %v662_v41, %s1822_s12  ;;  %s2190_s12 = scalar_lea.vmem [#allocation10], %s1442_s17  ;;  %s1827_s17 = smov 40  }
 0x346   : > { %v832_v46 = vpop.permute.xlu1 %831  ;;  %v747_v47 = vpop.permute.xlu0 %746 }
 0x347   : > { %1505 = vmatmul.mubr.msk.f32.vlgmr.msra.gmra.mrb[2].mxu1 %vm349_vm5, %v747_v47 }
 0x348   : > { %1568 = vmatpush3.bf16.msk.msra.mxu1 %vm2099_vm12, %v1566_v43  ;;  %1511 = vmatprep.mubr.msk.f32.mxu1 %vm1821_vm13, %v1809_v1 }
 0x349   : > { %1573 = vmatprep.subr.bf16.mxu1 %v1819_v17 }
 0x34a   : > { %v917_v52 = vpop.permute.xlu0 %916  ;;  %v1086_v53 = vpop.permute.xlu1 %1085 }
 0x34b   : > { %1512 = vmatmul.mubr.msk.f32.vlgmr.msra.gmra.mrb[4].mxu1 %vm349_vm5, %v832_v46  ;;  %1519 = vmatmul.mubr.msk.f32.vlgmr.msra.gmra.mrb[2].mxu0 %vm349_vm5, %v917_v52 }
 0x34c   : > { %1576 = vmatpush3.bf16.msk.msra.mxu1 %vm2099_vm12, %v1574_v48  ;;  %1580 = vmatpush3.bf16.msk.msra.mxu0 %vm2099_vm12, %v1578_v49 }
 0x34d   : > { %1532 = vmatprep.mubr.msk.f32.mxu0 %vm1821_vm13, %v1809_v1  ;;  %1525 = vmatprep.mubr.msk.f32.mxu1 %vm1821_vm13, %v1809_v1 }
 0x34e   : > { %1581 = vmatprep.subr.bf16.mxu1 %v1819_v17  ;;  %1585 = vmatprep.subr.bf16.mxu0 %v1819_v17  ;;  %v1256_v56 = vpop.permute.xlu1 %1255  ;;  %v1171_v57 = vpop.permute.xlu0 %1170 }
 0x34f   : > { %1526 = vmatmul.mubr.msk.f32.vlgmr.msra.gmra.mrb[6].mxu1 %vm349_vm5, %v662_v41  ;;  %1533 = vmatmul.mubr.msk.f32.vlgmr.msra.gmra.mrb[4].mxu0 %vm349_vm5, %v1086_v53 }
 0x350   : > { %1584 = vmatpush3.bf16.msk.msra.mxu1 %vm2099_vm12, %v1582_v54  ;;  %1588 = vmatpush3.bf16.msk.msra.mxu0 %vm2099_vm12, %v1586_v55 }
 0x351   : > { %1539 = vmatprep.mubr.msk.f32.mxu1 %vm1821_vm13, %v1809_v1  ;;  %1546 = vmatprep.mubr.msk.f32.mxu0 %vm1821_vm13, %v1809_v1 }
 0x353   : > { %1540 = vmatmul.mubr.msk.f32.vlgmr.msra.gmra.mrb[8].mxu1 %vm349_vm5, %v1171_v57  ;;  %1547 = vmatmul.mubr.msk.f32.vlgmr.msra.gmra.mrb[6].mxu0 %vm349_vm5, %v1256_v56  ;;  %vm1336_vm5 = vcmask 523712  }
 0x3a8   : > { %v738_v58 = vpop.f32.mrb[0].mxu1 }
 0x3a9   : > { %743 = vst.msk [vmem:[%s2190_s12] sm:$0xff] %vm742_vm14, %v738_v58  ;;  %v1499_v59 = vpop.f32.mrb[1].mxu1 }
 0x41a   : > { %v819_v60 = vpop.f32.mrb[2].mxu1 }
 0x41b   : > { %824 = vrot.lane.b32.xlu0 %v819_v60, %s1825_s10  ;;  %v1506_v61 = vpop.f32.mrb[3].mxu1 }
 0x41e   : > { %v904_v62 = vpop.f32.mrb[4].mxu1  ;;  %v989_v63 = vpop.f32.mrb[2].mxu0 }
 0x41f   : > { %v1520_v0 = vpop.f32.mrb[3].mxu0  ;;  %994 = vrot.lane.b32.xlu0 %v989_v63, %s1826_s13  ;;  %909 = vrot.lane.b32.xlu1 %v904_v62, %s1816_s11  ;;  %v1513_v2 = vpop.f32.mrb[5].mxu1  ;;  %s1465_s11 = sshll.u32 %s1882_s22, 7  ;;  %s1341_s22 = scalar_lea.sflag [#allocation7], %s1997_s16 }
 0x420   : > { %s2206_s6 = scalar_lea.hbm %s2258_s5, %s1465_s11 }
 0x422   : > { %v1073_v3 = vpop.f32.mrb[6].mxu1  ;;  %v1158_v4 = vpop.f32.mrb[4].mxu0 }
 0x423   : > { %v1534_v5 = vpop.f32.mrb[5].mxu0  ;;  %1163 = vrot.lane.b32.xlu0 %v1158_v4, %s1827_s17  ;;  %1078 = vrot.lane.b32.xlu1 %v1073_v3, %s1824_s29  ;;  %v1527_v6 = vpop.f32.mrb[7].mxu1  ;;  %s1354_s29 = sshll.u32 %s2190_s12, 4  ;;  %s2208_s29 = int_to_ptr.vmem [resolvable:$true] %s1354_s29 }
 0x424   : > { %s1733_s7 = scalar_lea.vmem %s2208_s29, 128  ;;  %p1740_p10 = scmp.lt.s32.totalorder %s2208_s29, %s1738_s24 }
 0x425   : > { %p1734_p4 = scmp.ne.s32.totalorder %s2208_s29, %s1733_s7  ;;  %p1741_p13 = scmp.lt.s32.totalorder %s1739_s26, %s1733_s7 }
 0x426   : > { %v1243_v7 = vpop.f32.mrb[8].mxu1  ;;  %v1328_v9 = vpop.f32.mrb[6].mxu0 }
 0x427   : > { %v1548_v8 = vpop.f32.mrb[7].mxu0  ;;  %1333 = vrot.lane.b32.xlu0 %v1328_v9, %s1828_s28  ;;  %1248 = vrot.lane.b32.xlu1 %v1243_v7, %s1829_s23  ;;  %v1541_v10 = vpop.f32.mrb[9].mxu1  ;;  %p1735_p6 = pnand %p1734_p4, %p1952_p12  ;;  %p1742_p3 = por %p1741_p13, %p1740_p10 }
 0x429   : > { %p1736_p8 = pneg %p1735_p6 }
 0x42b   : > { %p1743_p7 = pnand %p1742_p3, %p1736_p8 }
 0x48d   : > { %v825_v11 = vpop.permute.xlu0 %824 }
 0x48e   : > { %828 = vst.msk [vmem:[%s2190_s12] sm:$0xff] %vm827_vm15, %v825_v11 }
 0x491   : > { %v995_v12 = vpop.permute.xlu0 %994  ;;  %v910_v13 = vpop.permute.xlu1 %909 }
 0x492   : > { %913 = vst.msk [vmem:[%s2190_s12] sm:$0xff] %vm912_vm0, %v910_v13 }
 0x493   : > { %998 = vst.msk [vmem:[%s2190_s12] sm:$0xff] %vm997_vm1, %v995_v12 }
 0x495   : > { %v1164_v14 = vpop.permute.xlu0 %1163  ;;  %v1079_v15 = vpop.permute.xlu1 %1078 }
 0x496   : > { %1082 = vst.msk [vmem:[%s2190_s12] sm:$0xff] %vm1081_vm2, %v1079_v15 }
 0x497   : > { %1167 = vst.msk [vmem:[%s2190_s12] sm:$0xff] %vm1166_vm3, %v1164_v14 }
 0x499   : > { %v1334_v16 = vpop.permute.xlu0 %1333  ;;  %v1249_v17 = vpop.permute.xlu1 %1248 }
 0x49a   : > { %1252 = vst.msk [vmem:[%s2190_s12] sm:$0xff] %vm1251_vm4, %v1249_v17 }
 0x49b   : > { %1337 = vst.msk [vmem:[%s2190_s12] sm:$0xff] %vm1336_vm5, %v1334_v16 }
 0x49c   : > { %1339 = vst.msk [vmem:[%s2190_s12] sm:$0xff] %vm1338_vm6, %v1809_v1 }
 0x49d   : > { %1746 = shalt.err (!%p1743_p7)
}
 0x49e   : > { %s1747_s16 = scalar_lea.hbm %s2206_s6, 128  ;;  %s1751_s13 = scalar_lea.hbm %s2258_s5, 256 }
 0x49f   : > { %p1748_p9 = scmp.ne.s32.totalorder %s2206_s6, %s1747_s16  ;;  %p1752_p0 = scmp.lt.u32.totalorder %s2206_s6, %s2258_s5 }
 0x4a0   : > { %p1753_p11 = scmp.lt.u32.totalorder %s1751_s13, %s1747_s16  ;;  %p1755_p4 = scmp.lt.u32.totalorder %s1747_s16, %s2206_s6 }
 0x4a1   : > { %p1749_p2 = pnand %p1748_p9, %p1952_p12 }
 0x4a2   : > { %p1754_p1 = por %p1753_p11, %p1752_p0 }
 0x4a3   : > { %p1750_p5 = pneg %p1749_p2 }
 0x4a4   : > { %p1756_p6 = por %p1755_p4, %p1754_p1 }
 0x4a6   : > { %p1757_p8 = pnand %p1756_p6, %p1750_p5 }
 0x4a8   : > { %1760 = shalt.err (!%p1757_p8)
}
 0x4a9   : > { %1595 = dma.vmem_to_hbm [thread:$0]  (%p1952_p12), %s2208_s29, 128, %s2206_s6, %s1341_s22  }
 0x4aa PF: > { %s1366_s23 = sand.u32 1, %s1791_s18   ;;  %p2275_p10 = scmp.ne.s32.totalorder %s2263_s25, 0 }
 0x4ab   : > { %p2276_p13 = scmp.ge.s32.totalorder %s1803_s21, 2  ;;  %s1367_s11 = scalar_lea.sflag [#allocation7], %s1366_s23 }
 0x4ad   : > { %p1606_p3 = pnand %p2276_p13, %p2275_p10 }
 0x4af   : > { %1786 = dma.done.wait (!%p1606_p3), %s1367_s11, 128  }
 0x4b0   : > { %1788 = vsyncadd (!%p1606_p3), %s1367_s11, 4294967168  ;;  %p19_p7 = scmp.ge.s32.totalorder %s1917_s30, 4   ;;  %s2277_s18 = smov %s1795_s19 }
 0x4b1   : > { %s2278_s19 = smov %s1799_s20  ;;  %s2279_s20 = smov %s1948_s8 }
 0x4b2   : > { %s2280_s21 = smov %s1917_s30  ;;  %21 = sbr.rel (!%p19_p7) target bundleno = 6 (0x6), region = 90 }
 0x4b9   :  { %1372 = vsyncpa [#allocation6], 1 }
 0x4ba   :  { %1374 = vsyncpa [#allocation6 + $0x1], 1 }
 0x4bb   :  { %1375 = vsyncpa [#allocation9], 1 }
 0x4bc   :  { %1376 = vsyncpa [#allocation7], 1 }
 0x4bd   :  { %1378 = vsyncpa [#allocation7 + $0x1], 1 }

</bundles_post_ra>
